<compile_context>
chip_gen: v6e
topology: v6e:2x2x1
jax: 0.10.0
libtpu: 0.0.40
codegen_flags: <defaults>
</compile_context>

<pallas_src>
import jax
import jax.numpy as jnp
from jax.experimental import pallas as pl
from jax.experimental.pallas import tpu as pltpu

IMAGE_RGB_MEAN = [0.485, 0.456, 0.406]
IMAGE_RGB_STD = [0.229, 0.224, 0.225]

_LANE = 128
_SUBLANE = 8
# Per-block element budget: 1M f32 elements => ~4 MiB / block. Double-buffered
# input + output ~16 MiB pipelined -> near HBM roofline on v5e/v6e/v7x while
# staying well inside v7x's 64 MiB physical VMEM.
_MAX_BLOCK_ELEMS = 1024 * 1024
# Force a >=2-step grid (v7x: 2 TensorCores) for tensors above ~2 MiB.
_SPLIT_THRESHOLD_ELEMS = 512 * 1024


def _round_down(v, m):
    return (v // m) * m


def _round_up(v, m):
    return ((v + m - 1) // m) * m


def _pick_tiles(R, S):
    """Pick (tr, tc) block dims for a (R, S) array.

    Each block dim is either the full extent (always legal) or a multiple of
    (8, 128); edge blocks from cdiv grids are padded/masked by Pallas.
    """
    # Row (sublane) tile: start minimal, grow after the lane tile is known.
    tr = R if R <= _SUBLANE else _SUBLANE
    lane_cap = max(_LANE, _round_down(_MAX_BLOCK_ELEMS // max(1, tr), _LANE))
    tc = S if S <= lane_cap else lane_cap
    if R > _SUBLANE:
        row_cap = max(_SUBLANE, _round_down(_MAX_BLOCK_ELEMS // tc, _SUBLANE))
        tr = R if R <= row_cap else row_cap

    # v7x has 2 TensorCores and "parallel" axes shard grid steps across them:
    # a single-block grid leaves one TC idle. Force a 2-way split for
    # non-tiny tensors (harmless on 1-TC chips: just two smaller blocks).
    if pl.cdiv(R, tr) * pl.cdiv(S, tc) == 1 and R * S > _SPLIT_THRESHOLD_ELEMS:
        tc_half = _round_up(-(-S // 2), _LANE)
        if tc_half < S:
            tc = tc_half
        else:
            tr_half = _round_up(-(-R // 2), _SUBLANE)
            if tr_half < R:
                tr = tr_half
    return tr, tc


def rgb_kernel(scale_ref, bias_ref, x_ref, o_ref):
    # scale/bias: (tr, 1) f32, broadcast over the lane (spatial) axis.
    # (x - mean) / std == x * (1/std) + (-mean/std): one VPU mul+add in f32,
    # narrowed to the output dtype only at the store.
    x = x_ref[...].astype(jnp.float32)
    o_ref[...] = (x * scale_ref[...] + bias_ref[...]).astype(o_ref.dtype)


def rgb_normalize(x, mean, std, out_dtype=None, in_place=False):
    N, C, H, W = x.shape
    R = N * C
    S = H * W
    out_dtype = x.dtype if out_dtype is None else jnp.dtype(out_dtype)

    mean32 = jnp.asarray(mean, jnp.float32).reshape(C)
    std32 = jnp.asarray(std, jnp.float32).reshape(C)
    # Per-row (N*C, 1) scale/bias, kept in f32 regardless of x.dtype so the
    # FMA reformulation does not lose precision for bf16/fp16 inputs.
    scale = jnp.tile(1.0 / std32, N).reshape(R, 1)
    bias = jnp.tile(-mean32 / std32, N).reshape(R, 1)

    # Free, contiguous reshape: sublane axis = N*C, lane axis = H*W.
    x2 = x.reshape(R, S)

    tr, tc = _pick_tiles(R, S)
    grid = (pl.cdiv(R, tr), pl.cdiv(S, tc))

    extra = {}
    if in_place and out_dtype == x.dtype:
        # Normalize in place: reuse the input HBM buffer for the output.
        extra["input_output_aliases"] = {2: 0}

    out2 = pl.pallas_call(
        rgb_kernel,
        out_shape=jax.ShapeDtypeStruct((R, S), out_dtype),
        grid=grid,
        in_specs=[
            pl.BlockSpec((tr, 1), lambda r, s: (r, 0)),   # scale (f32)
            pl.BlockSpec((tr, 1), lambda r, s: (r, 0)),   # bias  (f32)
            pl.BlockSpec((tr, tc), lambda r, s: (r, s)),  # x
        ],
        out_specs=pl.BlockSpec((tr, tc), lambda r, s: (r, s)),
        compiler_params=pltpu.CompilerParams(
            # Pure elementwise / no reduction: every grid step writes a unique
            # output block, so both axes are "parallel" (megacore sharding).
            dimension_semantics=("parallel", "parallel"),
            vmem_limit_bytes=48 * 1024 * 1024,
        ),
        **extra,
    )(scale, bias, x2)

    return out2.reshape(N, C, H, W)


if __name__ == "__main__":
    key = jax.random.PRNGKey(0)
    N, C, H, W = 2, 3, 16, 16  # RGB module expects 3 channels
    x = jax.random.uniform(key, (N, C, H, W), dtype=jnp.float32)

    mean = jnp.asarray(IMAGE_RGB_MEAN, dtype=jnp.float32)
    std = jnp.asarray(IMAGE_RGB_STD, dtype=jnp.float32)

    out = rgb_normalize(x, mean, std)
    out = jax.block_until_ready(out)

    # Reference (plain JAX, identical to the PyTorch broadcasting semantics).
    ref = (x - mean.reshape(1, 3, 1, 1)) / std.reshape(1, 3, 1, 1)
    # scale/bias FMA reformulation differs from the divide by ~1 ulp.
    assert jnp.allclose(out, ref, atol=1e-5, rtol=1e-5), "mismatch vs reference"

    # If the downstream consumer accepts bf16, call with out_dtype=jnp.bfloat16
    # to halve write-side HBM traffic (kept f32 by default to preserve the
    # module's dtype semantics).
    print("KERNEL_OK")
</pallas_src>

<mosaic_0001>
module attributes {stable_mosaic.version = 11 : i64} {
  func.func @rgb_kernel(%arg0: i32, %arg1: i32, %arg2: memref<6x1xf32, #tpu.memory_space<vmem>>, %arg3: memref<6x1xf32, #tpu.memory_space<vmem>>, %arg4: memref<6x256xf32, #tpu.memory_space<vmem>>, %arg5: memref<6x256xf32, #tpu.memory_space<vmem>>) attributes {dimension_semantics = [#tpu.dimension_semantics<parallel>, #tpu.dimension_semantics<parallel>], iteration_bounds = array<i64: 1, 1>, scalar_prefetch = 0 : i64, scratch_operands = 0 : i64, tpu.core_type = #tpu.core_type<tc>, window_params = [{transform_indices = @transform_0, window_bounds = array<i64: 6, 1>}, {transform_indices = @transform_1, window_bounds = array<i64: 6, 1>}, {transform_indices = @transform_2, window_bounds = array<i64: 6, 256>}, {transform_indices = @transform_3, window_bounds = array<i64: 6, 256>}]} {
    %c0 = arith.constant 0 : index
    %c0_0 = arith.constant 0 : index
    %0 = vector.load %arg4[%c0, %c0_0] : memref<6x256xf32, #tpu.memory_space<vmem>>, vector<6x256xf32>
    %c0_1 = arith.constant 0 : index
    %c0_2 = arith.constant 0 : index
    %1 = vector.load %arg2[%c0_1, %c0_2] : memref<6x1xf32, #tpu.memory_space<vmem>>, vector<6x1xf32>
    %2 = vector.broadcast %1 : vector<6x1xf32> to vector<6x256xf32>
    %3 = arith.mulf %0, %2 : vector<6x256xf32>
    %c0_3 = arith.constant 0 : index
    %c0_4 = arith.constant 0 : index
    %4 = vector.load %arg3[%c0_3, %c0_4] : memref<6x1xf32, #tpu.memory_space<vmem>>, vector<6x1xf32>
    %5 = vector.broadcast %4 : vector<6x1xf32> to vector<6x256xf32>
    %6 = arith.addf %3, %5 : vector<6x256xf32>
    %c0_5 = arith.constant 0 : index
    %c0_6 = arith.constant 0 : index
    %7 = vector.load %arg5[%c0_5, %c0_6] : memref<6x256xf32, #tpu.memory_space<vmem>>, vector<6x256xf32>
    tpu.vector_store %arg5[%c0_5, %c0_6], %6 {strides = array<i32>} : memref<6x256xf32, #tpu.memory_space<vmem>>, vector<6x256xf32>,
    return
  }
  func.func @transform_0(%arg0: i32, %arg1: i32) -> (i32, i32) {
    %c0_i32 = arith.constant 0 : i32
    %c0_i32_0 = arith.constant 0 : i32
    return %arg0, %c0_i32 : i32, i32
  }
  func.func @transform_1(%arg0: i32, %arg1: i32) -> (i32, i32) {
    %c0_i32 = arith.constant 0 : i32
    %c0_i32_0 = arith.constant 0 : i32
    return %arg0, %c0_i32 : i32, i32
  }
  func.func @transform_2(%arg0: i32, %arg1: i32) -> (i32, i32) {
    %c0_i32 = arith.constant 0 : i32
    return %arg0, %arg1 : i32, i32
  }
  func.func @transform_3(%arg0: i32, %arg1: i32) -> (i32, i32) {
    %c0_i32 = arith.constant 0 : i32
    return %arg0, %arg1 : i32, i32
  }
}

</mosaic_0001>

<bundles_post_ra>
// kernel: tpu_custom_call.1
= control target key start
LH: loop header
LB: loop body
LE: loop exit
PB: predicated region body
PF: predicated region fallthrough
CT: control target
= control target key end

     0   :  { %v74_v1 = vmov 0   ;;  %s111_s0 = inlined_call_operand.vmem [shape: f32[6,1], index: 0, kind: input, shape index: {}]   ;;  %s112_s1 = inlined_call_operand.vmem [shape: f32[6,1], index: 1, kind: input, shape index: {}]   ;;  %s113_s2 = inlined_call_operand.vmem [shape: f32[6,256], index: 2, kind: input, shape index: {}]   ;;  %s114_s3 = inlined_call_operand.hbm [shape: f32[6,256], index: 3, kind: output, shape index: {}]  }
   0x1   :  { %v17_v0 = vld [vmem:[%s111_s0] sm:$0x3f]  ;;  %51 = vset.pattern.permute.xlu0 %v74_v1 }
   0x2   :  { %8 = vsyncpa [#allocation3], 0  ;;  %20 = vperm.xlu0 %51, %v17_v0   ;;  %v25_v2 = vld [vmem:[%s112_s1] sm:$0x3f]  ;;  %v16_v5 = vld [vmem:[%s113_s2 + $0x8] sm:$0x3f] }
   0x3   :  { %v15_v4 = vld [vmem:[%s113_s2] sm:$0x3f]  ;;  %s75_s20 = smov [#allocation2]  }
   0x4   :  { %s41_s0 = sshll.u32 %s75_s20, 4  ;;  %s42_s0 = int_to_ptr.vmem [resolvable:$true] %s41_s0 }
   0x5   :  { %s52_s1 = scalar_lea.vmem %s42_s0, 256  ;;  %p57_p1 = scmp.lt.s32.totalorder %s42_s0, %s42_s0 }
   0x6   :  { %28 = vperm.xlu0 %51, %v25_v2   ;;  %p53_p0 = scmp.ne.s32.totalorder %s42_s0, %s52_s1  ;;  %p58_p2 = scmp.lt.s32.totalorder %s52_s1, %s52_s1 }
   0x8   :  { %p59_p3 = por %p58_p2, %p57_p1 }
   0xa   :  { %p60_p4 = pnand %p59_p3, %p53_p0 }
  0x7d   :  { %v21_v3 = vpop.permute.xlu0 %20 }
  0x7e   :  { %v23_v6 = vmul.f32 %v21_v3, %v15_v4  ;;  %v24_v7 = vmul.f32 %v21_v3, %v16_v5 }
  0x81   :  { %v29_v8 = vpop.permute.xlu0 %28 }
  0x82   :  { %v31_v9 = vadd.f32 %v29_v8, %v23_v6  ;;  %v32_v10 = vadd.f32 %v29_v8, %v24_v7 }
  0x84   :  { %33 = vst [vmem:[#allocation2] sm:$0x3f] %v31_v9  ;;  %34 = vst [vmem:[#allocation2 + $0x8] sm:$0x3f] %v32_v10 }
  0x85   :  { %63 = shalt.err (!%p60_p4)
}
  0x86   :  { %44 = dma.vmem_to_hbm [thread:$0]  %s42_s0, 256, %s114_s3, [#allocation3]  }
  0x87   :  { %72 = dma.done.wait [#allocation3], 256  }
  0x88   :  { %73 = vsyncadd [#allocation3], 4294967040 }
  0x89   :  { %48 = vsyncpa [#allocation3], 1 }

</bundles_post_ra>
